<compile_context>
chip_gen: v7x
topology: tpu7x:2x2x1
jax: 0.10.0
libtpu: 0.0.40
codegen_flags: <defaults>
</compile_context>

<pallas_src>
import math

import jax
import jax.numpy as jnp
from jax.experimental import pallas as pl
from jax.experimental.pallas import tpu as pltpu

_SUBLANE = 8
_LANE = 128


def _round_up(x: int, m: int) -> int:
    return ((x + m - 1) // m) * m


def _pad_feature_dim(d: int) -> int:
    # v6e/v7x MXUs are 256x256: pad >=256-wide dims to 256 multiples to fill
    # the systolic array.  Tiny dims stay at 128 (lane width / v5e MXU size)
    # so we don't DMA extra zeros; 256 is a multiple of 128 so this padding is
    # also layout-legal on v5e.
    return _round_up(d, 256) if d >= 256 else _round_up(d, _LANE)


def _make_ffn_kernel(num_layers, activations, compute_dtype):
    """Fused multi-layer Linear+activation kernel.

    Kernel args: (x_ref, w0, b0, w1, b1, ..., o_ref)
      x_ref : (tb, in_pad)            bf16 batch tile
      wi    : (in_i_pad, out_i_pad)   bf16 pre-transposed weight
      bi    : (1, out_i_pad)          f32 bias row
      o_ref : (tb, out_pad)           f32 output tile
    """

    def kernel(x_ref, *refs):
        o_ref = refs[-1]
        params = refs[:-1]
        h = x_ref[...]                                  # bf16 operand for MXU
        for li in range(num_layers):
            w = params[2 * li][...]
            b = params[2 * li + 1][...]
            # MXU matmul (bf16 operands, f32 accumulation); bias + activation
            # run on the VPU/EUP in f32 (v5e has no bf16 VPU/EUP).
            h = jnp.dot(h, w, preferred_element_type=jnp.float32) + b
            act = activations[li]
            if act is not None:
                h = act(h)
            if li + 1 < num_layers:
                # bf16 operand for the next MXU pass; also halves the VMEM
                # footprint of the intermediate at wide hidden dims.
                h = h.astype(compute_dtype)
        o_ref[...] = h.astype(o_ref.dtype)

    return kernel


def _invariant_spec(shape, single_buffer):
    """BlockSpec for a grid-invariant operand (same block every grid step)."""
    if single_buffer:
        # Constant index_map -> never refetched -> single buffer is enough;
        # default double-buffering would just waste VMEM (2x every weight).
        return pl.BlockSpec(shape, lambda i: (0, 0), pipeline_mode=pl.Buffered(1))
    return pl.BlockSpec(shape, lambda i: (0, 0))


def make_feed_forward_net(weights, biases, activations, *, compute_dtype=jnp.bfloat16):
    """Build a fused FeedForwardNet forward pass.

    weights[i]:     (out_i, in_i) float32 -- PyTorch nn.Linear layout.
    biases[i]:      (out_i,) float32, or None for a bias-less layer.
    activations[i]: callable (elementwise) or None.

    Parameter padding / transposition happens ONCE here (hoisted out of the
    per-call path); the returned `forward(x)` only pays for the x pad and the
    single fused pallas_call.
    """
    num_layers = len(weights)
    assert len(biases) == num_layers and len(activations) == num_layers

    in_f = weights[0].shape[1]
    out_f = weights[-1].shape[0]
    dims = [in_f] + [w.shape[0] for w in weights]
    dims_pad = [_pad_feature_dim(d) for d in dims]

    padded_params = []
    param_bytes = 0
    for li in range(num_layers):
        w = jnp.asarray(weights[li], jnp.float32).T      # -> (in_i, out_i)
        wp = (
            jnp.zeros((dims_pad[li], dims_pad[li + 1]), compute_dtype)
            .at[: w.shape[0], : w.shape[1]]
            .set(w.astype(compute_dtype))
        )
        bp = jnp.zeros((1, dims_pad[li + 1]), jnp.float32)
        if biases[li] is not None:
            b = jnp.asarray(biases[li], jnp.float32).reshape(1, -1)
            bp = bp.at[:, : b.shape[1]].set(b)
        padded_params.extend([wp, bp])
        param_bytes += wp.size * wp.dtype.itemsize + bp.size * bp.dtype.itemsize

    kernel = _make_ffn_kernel(num_layers, activations, compute_dtype)

    def _call(x_pad, grid, tb, single_buffer):
        in_specs = [pl.BlockSpec((tb, dims_pad[0]), lambda i: (i, 0))]
        for li in range(num_layers):
            in_specs.append(
                _invariant_spec((dims_pad[li], dims_pad[li + 1]), single_buffer))
            in_specs.append(_invariant_spec((1, dims_pad[li + 1]), single_buffer))
        out_spec = pl.BlockSpec((tb, dims_pad[-1]), lambda i: (i, 0))

        b_total = grid * tb

        # Explicit VMEM budget with headroom; never claim v7x's full 64 MiB.
        x_tile = tb * dims_pad[0] * 2                  # bf16, double-buffered
        o_tile = tb * dims_pad[-1] * 4                 # f32, double-buffered
        h_tile = tb * max(dims_pad) * 4                # f32 intermediate activations
        vmem_need = 2 * x_tile + 2 * o_tile + param_bytes + 2 * h_tile
        vmem_limit = int(min(max(2 * vmem_need, 32 * 1024 * 1024),
                             48 * 1024 * 1024))

        cost = pl.CostEstimate(
            flops=2 * b_total * sum(dims_pad[i] * dims_pad[i + 1]
                                    for i in range(num_layers)),
            transcendentals=b_total * sum(
                dims_pad[li + 1] for li in range(num_layers)
                if activations[li] is not None),
            bytes_accessed=(x_pad.size * x_pad.dtype.itemsize + param_bytes
                            + b_total * dims_pad[-1] * 4),
        )

        return pl.pallas_call(
            kernel,
            out_shape=jax.ShapeDtypeStruct((b_total, dims_pad[-1]), jnp.float32),
            grid=(grid,),
            in_specs=in_specs,
            out_specs=out_spec,
            compiler_params=pltpu.CompilerParams(
                dimension_semantics=("parallel",),   # shard batch tiles over v7x's 2 TCs
                vmem_limit_bytes=vmem_limit,
                # Lets XLA fuse the x zero-pad into the pallas_call input when
                # the caller wraps this forward in jax.jit.
                allow_input_fusion=[True] + [False] * (2 * num_layers),
            ),
            cost_estimate=cost,
        )(x_pad, *padded_params)

    def forward(x, *, tb=None):
        B = x.shape[0]
        B8 = _round_up(B, _SUBLANE)
        if tb is None:
            # Tile sizing:
            #  * >= 2 grid steps whenever possible, so both v7x TensorCores
            #    get work under dimension_semantics=("parallel",);
            #  * tile <= 512 rows (fits v7x's 64 MiB VMEM comfortably; could
            #    be raised to 1024 on v5e/v6e's 128 MiB);
            #  * sized from B itself, so the last-tile waste is at most a few
            #    sublanes (no round_up(B, tb) blow-up).
            num_tiles = max(2, pl.cdiv(B8, 512))
            tile = min(512, max(_SUBLANE,
                                _round_up(pl.cdiv(B8, num_tiles), _SUBLANE)))
        else:
            tile = _round_up(tb, _SUBLANE)
        grid = pl.cdiv(B8, tile)
        b_total = grid * tile

        if (B, x.shape[1]) == (b_total, dims_pad[0]):
            x_pad = x.astype(compute_dtype)           # already aligned: cast only
        else:
            x_pad = (
                jnp.zeros((b_total, dims_pad[0]), compute_dtype)
                .at[:B, : x.shape[1]]
                .set(x.astype(compute_dtype))
            )

        try:
            out_pad = _call(x_pad, grid, tile, single_buffer=True)
        except Exception:
            # Fallback for jax versions where pipeline_mode=pl.Buffered(1) is
            # not accepted on grid-invariant BlockSpecs.
            out_pad = _call(x_pad, grid, tile, single_buffer=False)

        if (b_total, dims_pad[-1]) == (B, out_f):
            return out_pad
        return out_pad[:B, :out_f]

    return forward


if __name__ == "__main__":
    # Configuration from the module docstring example:
    #   FeedForwardNet(4, [(8, 'tanh'), (6, 'tanh')])
    batch = 2
    input_size = 4
    layer_sizes = [8, 6]
    activations = [jnp.tanh, jnp.tanh]

    key = jax.random.PRNGKey(0)
    keys = jax.random.split(key, 1 + 2 * len(layer_sizes))

    x = jax.random.normal(keys[0], (batch, input_size), dtype=jnp.float32)

    # nn.Linear-style deterministic init: U(-1/sqrt(fan_in), 1/sqrt(fan_in)),
    # PyTorch (out_features, in_features) layout.
    weights, biases = [], []
    fan_in = input_size
    for li, size in enumerate(layer_sizes):
        bound = 1.0 / math.sqrt(fan_in)
        w = jax.random.uniform(keys[1 + 2 * li], (size, fan_in), jnp.float32,
                               minval=-bound, maxval=bound)
        b = jax.random.uniform(keys[2 + 2 * li], (size,), jnp.float32,
                               minval=-bound, maxval=bound)
        weights.append(w)
        biases.append(b)
        fan_in = size

    forward = make_feed_forward_net(weights, biases, activations)
    out = jax.block_until_ready(forward(x))

    # Pure-JAX f32 reference (PyTorch semantics: x @ W.T + b, then activation).
    ref = x
    for w, b, act in zip(weights, biases, activations):
        ref = ref @ w.T + b
        if act is not None:
            ref = act(ref)

    assert out.shape == (batch, layer_sizes[-1]), out.shape
    # Kernel matmuls use bf16 operands (f32 accumulation), so compare against
    # the f32 reference with a bf16-level tolerance.
    assert jnp.allclose(out, ref, atol=2e-2, rtol=2e-2), (out, ref)

    print("KERNEL_OK")
</pallas_src>

<mosaic_0001>
module attributes {stable_mosaic.version = 11 : i64} {
  func.func @kernel(%arg0: i32, %arg1: memref<8x128xbf16, #tpu.memory_space<vmem>>, %arg2: memref<128x128xbf16, #tpu.memory_space<vmem>>, %arg3: memref<1x128xf32, #tpu.memory_space<vmem>>, %arg4: memref<128x128xbf16, #tpu.memory_space<vmem>>, %arg5: memref<1x128xf32, #tpu.memory_space<vmem>>, %arg6: memref<8x128xf32, #tpu.memory_space<vmem>>) attributes {dimension_semantics = [#tpu.dimension_semantics<parallel>], iteration_bounds = array<i64: 1>, scalar_prefetch = 0 : i64, scratch_operands = 0 : i64, tpu.core_type = #tpu.core_type<tc>, window_params = [{transform_indices = @transform_0, window_bounds = array<i64: 8, 128>}, {pipeline_mode = #tpu.pipeline_mode<synchronous>, transform_indices = @transform_1, window_bounds = array<i64: 128, 128>}, {pipeline_mode = #tpu.pipeline_mode<synchronous>, transform_indices = @transform_2, window_bounds = array<i64: 1, 128>}, {pipeline_mode = #tpu.pipeline_mode<synchronous>, transform_indices = @transform_3, window_bounds = array<i64: 128, 128>}, {pipeline_mode = #tpu.pipeline_mode<synchronous>, transform_indices = @transform_4, window_bounds = array<i64: 1, 128>}, {transform_indices = @transform_5, window_bounds = array<i64: 8, 128>}]} {
    %c0 = arith.constant 0 : index
    %c0_0 = arith.constant 0 : index
    %0 = vector.load %arg1[%c0, %c0_0] : memref<8x128xbf16, #tpu.memory_space<vmem>>, vector<8x128xbf16>
    %c0_1 = arith.constant 0 : index
    %c0_2 = arith.constant 0 : index
    %1 = vector.load %arg2[%c0_1, %c0_2] : memref<128x128xbf16, #tpu.memory_space<vmem>>, vector<128x128xbf16>
    %c0_3 = arith.constant 0 : index
    %c0_4 = arith.constant 0 : index
    %2 = vector.load %arg3[%c0_3, %c0_4] : memref<1x128xf32, #tpu.memory_space<vmem>>, vector<1x128xf32>
    %cst = arith.constant dense<0.000000e+00> : vector<8x128xf32>
    %3 = tpu.matmul %0, %1, %cst {dimension_numbers = #tpu.dot_dimension_numbers<[1], [0], [0], [1], [0, 0, 1, 1], [], []>} : vector<8x128xbf16>, vector<128x128xbf16>, vector<8x128xf32> -> vector<8x128xf32>
    %4 = vector.broadcast %2 : vector<1x128xf32> to vector<8x128xf32>
    %5 = arith.addf %3, %4 : vector<8x128xf32>
    %6 = math.tanh %5 : vector<8x128xf32>
    %7 = arith.truncf %6 : vector<8x128xf32> to vector<8x128xbf16>
    %c0_5 = arith.constant 0 : index
    %c0_6 = arith.constant 0 : index
    %8 = vector.load %arg4[%c0_5, %c0_6] : memref<128x128xbf16, #tpu.memory_space<vmem>>, vector<128x128xbf16>
    %c0_7 = arith.constant 0 : index
    %c0_8 = arith.constant 0 : index
    %9 = vector.load %arg5[%c0_7, %c0_8] : memref<1x128xf32, #tpu.memory_space<vmem>>, vector<1x128xf32>
    %cst_9 = arith.constant dense<0.000000e+00> : vector<8x128xf32>
    %10 = tpu.matmul %7, %8, %cst_9 {dimension_numbers = #tpu.dot_dimension_numbers<[1], [0], [0], [1], [0, 0, 1, 1], [], []>} : vector<8x128xbf16>, vector<128x128xbf16>, vector<8x128xf32> -> vector<8x128xf32>
    %11 = vector.broadcast %9 : vector<1x128xf32> to vector<8x128xf32>
    %12 = arith.addf %10, %11 : vector<8x128xf32>
    %13 = math.tanh %12 : vector<8x128xf32>
    %c0_10 = arith.constant 0 : index
    %c0_11 = arith.constant 0 : index
    %14 = vector.load %arg6[%c0_10, %c0_11] : memref<8x128xf32, #tpu.memory_space<vmem>>, vector<8x128xf32>
    tpu.vector_store %arg6[%c0_10, %c0_11], %13 {strides = array<i32>} : memref<8x128xf32, #tpu.memory_space<vmem>>, vector<8x128xf32>,
    return
  }
  func.func @transform_0(%arg0: i32) -> (i32, i32) {
    %c0_i32 = arith.constant 0 : i32
    %c0_i32_0 = arith.constant 0 : i32
    return %arg0, %c0_i32 : i32, i32
  }
  func.func @transform_1(%arg0: i32) -> (i32, i32) {
    %c0_i32 = arith.constant 0 : i32
    %c0_i32_0 = arith.constant 0 : i32
    %c0_i32_1 = arith.constant 0 : i32
    return %c0_i32, %c0_i32_0 : i32, i32
  }
  func.func @transform_2(%arg0: i32) -> (i32, i32) {
    %c0_i32 = arith.constant 0 : i32
    %c0_i32_0 = arith.constant 0 : i32
    %c0_i32_1 = arith.constant 0 : i32
    return %c0_i32, %c0_i32_0 : i32, i32
  }
  func.func @transform_3(%arg0: i32) -> (i32, i32) {
    %c0_i32 = arith.constant 0 : i32
    %c0_i32_0 = arith.constant 0 : i32
    %c0_i32_1 = arith.constant 0 : i32
    return %c0_i32, %c0_i32_0 : i32, i32
  }
  func.func @transform_4(%arg0: i32) -> (i32, i32) {
    %c0_i32 = arith.constant 0 : i32
    %c0_i32_0 = arith.constant 0 : i32
    %c0_i32_1 = arith.constant 0 : i32
    return %c0_i32, %c0_i32_0 : i32, i32
  }
  func.func @transform_5(%arg0: i32) -> (i32, i32) {
    %c0_i32 = arith.constant 0 : i32
    %c0_i32_0 = arith.constant 0 : i32
    return %arg0, %c0_i32 : i32, i32
  }
}

module attributes {stable_mosaic.version = 11 : i64} {
  func.func @kernel(%arg0: i32, %arg1: memref<8x128xbf16, #tpu.memory_space<vmem>>, %arg2: memref<128x128xbf16, #tpu.memory_space<vmem>>, %arg3: memref<1x128xf32, #tpu.memory_space<vmem>>, %arg4: memref<128x128xbf16, #tpu.memory_space<vmem>>, %arg5: memref<1x128xf32, #tpu.memory_space<vmem>>, %arg6: memref<8x128xf32, #tpu.memory_space<vmem>>) attributes {dimension_semantics = [#tpu.dimension_semantics<parallel>], iteration_bounds = array<i64: 1>, scalar_prefetch = 0 : i64, scratch_operands = 0 : i64, tpu.core_type = #tpu.core_type<tc>, window_params = [{transform_indices = @transform_0, window_bounds = array<i64: 8, 128>}, {pipeline_mode = #tpu.pipeline_mode<synchronous>, transform_indices = @transform_1, window_bounds = array<i64: 128, 128>}, {pipeline_mode = #tpu.pipeline_mode<synchronous>, transform_indices = @transform_2, window_bounds = array<i64: 1, 128>}, {pipeline_mode = #tpu.pipeline_mode<synchronous>, transform_indices = @transform_3, window_bounds = array<i64: 128, 128>}, {pipeline_mode = #tpu.pipeline_mode<synchronous>, transform_indices = @transform_4, window_bounds = array<i64: 1, 128>}, {transform_indices = @transform_5, window_bounds = array<i64: 8, 128>}]} {
    %c0 = arith.constant 0 : index
    %c0_0 = arith.constant 0 : index
    %0 = vector.load %arg1[%c0, %c0_0] : memref<8x128xbf16, #tpu.memory_space<vmem>>, vector<8x128xbf16>
    %c0_1 = arith.constant 0 : index
    %c0_2 = arith.constant 0 : index
    %1 = vector.load %arg2[%c0_1, %c0_2] : memref<128x128xbf16, #tpu.memory_space<vmem>>, vector<128x128xbf16>
    %c0_3 = arith.constant 0 : index
    %c0_4 = arith.constant 0 : index
    %2 = vector.load %arg3[%c0_3, %c0_4] : memref<1x128xf32, #tpu.memory_space<vmem>>, vector<1x128xf32>
    %cst = arith.constant dense<0.000000e+00> : vector<8x128xf32>
    %3 = tpu.matmul %0, %1, %cst {dimension_numbers = #tpu.dot_dimension_numbers<[1], [0], [0], [1], [0, 0, 1, 1], [], []>} : vector<8x128xbf16>, vector<128x128xbf16>, vector<8x128xf32> -> vector<8x128xf32>
    %4 = vector.broadcast %2 : vector<1x128xf32> to vector<8x128xf32>
    %5 = arith.addf %3, %4 : vector<8x128xf32>
    %6 = math.tanh %5 : vector<8x128xf32>
    %7 = arith.truncf %6 : vector<8x128xf32> to vector<8x128xbf16>
    %c0_5 = arith.constant 0 : index
    %c0_6 = arith.constant 0 : index
    %8 = vector.load %arg4[%c0_5, %c0_6] : memref<128x128xbf16, #tpu.memory_space<vmem>>, vector<128x128xbf16>
    %c0_7 = arith.constant 0 : index
    %c0_8 = arith.constant 0 : index
    %9 = vector.load %arg5[%c0_7, %c0_8] : memref<1x128xf32, #tpu.memory_space<vmem>>, vector<1x128xf32>
    %cst_9 = arith.constant dense<0.000000e+00> : vector<8x128xf32>
    %10 = tpu.matmul %7, %8, %cst_9 {dimension_numbers = #tpu.dot_dimension_numbers<[1], [0], [0], [1], [0, 0, 1, 1], [], []>} : vector<8x128xbf16>, vector<128x128xbf16>, vector<8x128xf32> -> vector<8x128xf32>
    %11 = vector.broadcast %9 : vector<1x128xf32> to vector<8x128xf32>
    %12 = arith.addf %10, %11 : vector<8x128xf32>
    %13 = math.tanh %12 : vector<8x128xf32>
    %c0_10 = arith.constant 0 : index
    %c0_11 = arith.constant 0 : index
    %14 = vector.load %arg6[%c0_10, %c0_11] : memref<8x128xf32, #tpu.memory_space<vmem>>, vector<8x128xf32>
    tpu.vector_store %arg6[%c0_10, %c0_11], %13 {strides = array<i32>} : memref<8x128xf32, #tpu.memory_space<vmem>>, vector<8x128xf32>,
    return
  }
  func.func @transform_0(%arg0: i32) -> (i32, i32) {
    %c0_i32 = arith.constant 0 : i32
    %c0_i32_0 = arith.constant 0 : i32
    return %arg0, %c0_i32 : i32, i32
  }
  func.func @transform_1(%arg0: i32) -> (i32, i32) {
    %c0_i32 = arith.constant 0 : i32
    %c0_i32_0 = arith.constant 0 : i32
    %c0_i32_1 = arith.constant 0 : i32
    return %c0_i32, %c0_i32_0 : i32, i32
  }
  func.func @transform_2(%arg0: i32) -> (i32, i32) {
    %c0_i32 = arith.constant 0 : i32
    %c0_i32_0 = arith.constant 0 : i32
    %c0_i32_1 = arith.constant 0 : i32
    return %c0_i32, %c0_i32_0 : i32, i32
  }
  func.func @transform_3(%arg0: i32) -> (i32, i32) {
    %c0_i32 = arith.constant 0 : i32
    %c0_i32_0 = arith.constant 0 : i32
    %c0_i32_1 = arith.constant 0 : i32
    return %c0_i32, %c0_i32_0 : i32, i32
  }
  func.func @transform_4(%arg0: i32) -> (i32, i32) {
    %c0_i32 = arith.constant 0 : i32
    %c0_i32_0 = arith.constant 0 : i32
    %c0_i32_1 = arith.constant 0 : i32
    return %c0_i32, %c0_i32_0 : i32, i32
  }
  func.func @transform_5(%arg0: i32) -> (i32, i32) {
    %c0_i32 = arith.constant 0 : i32
    %c0_i32_0 = arith.constant 0 : i32
    return %arg0, %c0_i32 : i32, i32
  }
}

</mosaic_0001>

<bundles_post_ra>
// kernel: tpu_custom_call.1
= control target key start
LH: loop header
LB: loop body
LE: loop exit
PB: predicated region body
PF: predicated region fallthrough
CT: control target
= control target key end

     0   :  { %10 = vsyncpa [#allocation3], 0  ;;  %s600_s0 = inlined_call_operand.hbm [shape: bf16[8,128], index: 0, kind: input, shape index: {}]   ;;  %s601_s1 = inlined_call_operand.hbm [shape: bf16[128,128], index: 1, kind: input, shape index: {}]   ;;  %s602_s2 = inlined_call_operand.vmem [shape: f32[1,128], index: 2, kind: input, shape index: {}]   ;;  %s603_s3 = inlined_call_operand.hbm [shape: bf16[128,128], index: 3, kind: input, shape index: {}]   ;;  %s604_s4 = inlined_call_operand.vmem [shape: f32[1,128], index: 4, kind: input, shape index: {}]   ;;  %s605_s5 = inlined_call_operand.hbm [shape: f32[8,128], index: 5, kind: output, shape index: {}]  }
   0x1   :  { %11 = vsyncpa [#allocation6], 0 }
   0x2   :  { %12 = vsyncpa [#allocation4], 0  ;;  %s502_s18 = smov [#allocation5]   ;;  %s408_s22 = scalar_lea.hbm %s601_s1, 1024 }
   0x3   :  { %s28_s19 = sshll.u32 %s502_s18, 4  ;;  %p409_p0 = scmp.ne.s32.totalorder %s601_s1, %s408_s22  ;;  %s29_s19 = int_to_ptr.vmem [resolvable:$true] %s28_s19 }
   0x4   :  { %p412_p1 = scmp.lt.u32.totalorder %s408_s22, %s601_s1 }
   0x6   :  { %p414_p2 = pnand %p412_p1, %p409_p0 }
   0x8   :  { %417 = shalt.err (!%p414_p2)
}
   0x9   :  { %s418_s27 = scalar_lea.vmem %s29_s19, 1024  ;;  %p423_p4 = scmp.lt.s32.totalorder %s29_s19, %s29_s19 }
   0xa   :  { %p419_p3 = scmp.ne.s32.totalorder %s29_s19, %s418_s27  ;;  %p424_p5 = scmp.lt.s32.totalorder %s418_s27, %s418_s27 }
   0xc   :  { %p425_p6 = por %p424_p5, %p423_p4 }
   0xe   :  { %p426_p7 = pnand %p425_p6, %p419_p3 }
  0x10   :  { %429 = shalt.err (!%p426_p7)
}
  0x11   :  { %s503_s28 = smov 64   ;;  %s504_s29 = smov 4  }
  0x12   :  { %34 = dma.hbm_to_vmem [thread:$0]  %s601_s1, 1024, %s29_s19, [#allocation6], %s503_s28, %s503_s28, %s504_s29  }
  0x13   :  { %s505_s7 = smov [#allocation2]   ;;  %s506_s9 = smov [#allocation7]  }
  0x14   :  { %s19_s8 = sshll.u32 %s505_s7, 4  ;;  %s42_s10 = sshll.u32 %s506_s9, 4  ;;  %s20_s8 = int_to_ptr.vmem [resolvable:$true] %s19_s8  ;;  %s43_s10 = int_to_ptr.vmem [resolvable:$true] %s42_s10 }
  0x15   :  { %s430_s13 = scalar_lea.hbm %s600_s0, 64 }
  0x16   :  { %p431_p8 = scmp.ne.s32.totalorder %s600_s0, %s430_s13  ;;  %p434_p9 = scmp.lt.u32.totalorder %s430_s13, %s600_s0 }
  0x18   :  { %p436_p10 = pnand %p434_p9, %p431_p8 }
  0x1a   :  { %439 = shalt.err (!%p436_p10)
}
  0x1b   :  { %s440_s1 = scalar_lea.vmem %s20_s8, 64  ;;  %p445_p12 = scmp.lt.s32.totalorder %s20_s8, %s20_s8 }
  0x1c   :  { %p441_p11 = scmp.ne.s32.totalorder %s20_s8, %s440_s1  ;;  %p446_p13 = scmp.lt.s32.totalorder %s440_s1, %s440_s1 }
  0x1e   :  { %p447_p0 = por %p446_p13, %p445_p12 }
  0x20   :  { %p448_p1 = pnand %p447_p0, %p441_p11 }
  0x22   :  { %451 = shalt.err (!%p448_p1)
}
  0x23   :  { %22 = dma.hbm_to_vmem [thread:$0]  %s600_s0, 64, %s20_s8, [#allocation3]  }
  0x24   :  { %s452_s22 = scalar_lea.hbm %s603_s3, 1024 }
  0x25   :  { %p453_p2 = scmp.ne.s32.totalorder %s603_s3, %s452_s22  ;;  %p456_p3 = scmp.lt.u32.totalorder %s452_s22, %s603_s3 }
  0x27   :  { %p458_p4 = pnand %p456_p3, %p453_p2 }
  0x29   :  { %461 = shalt.err (!%p458_p4)
}
  0x2a   :  { %s462_s27 = scalar_lea.vmem %s43_s10, 1024  ;;  %p467_p6 = scmp.lt.s32.totalorder %s43_s10, %s43_s10 }
  0x2b   :  { %p463_p5 = scmp.ne.s32.totalorder %s43_s10, %s462_s27  ;;  %p468_p7 = scmp.lt.s32.totalorder %s462_s27, %s462_s27 }
  0x2d   :  { %p469_p8 = por %p468_p7, %p467_p6 }
  0x2f   :  { %p470_p9 = pnand %p469_p8, %p463_p5 }
  0x31   :  { %473 = shalt.err (!%p470_p9)
}
  0x32   :  { %48 = dma.hbm_to_vmem [thread:$0]  %s603_s3, 1024, %s43_s10, [#allocation6], %s503_s28, %s503_s28, %s504_s29  }
  0x33   :  { %496 = dma.done.wait [#allocation3], 64  }
  0x34   :  { %497 = vsyncadd [#allocation3], 4294967232 }
  0x35   :  { %498 = dma.done.wait [#allocation6], 2048  }
  0x36   :  { %499 = vsyncadd [#allocation6], 4294965248  ;;  %v507_v0 = vmov 0.0   ;;  %vm508_vm0 = vmmov 0   ;;  %v388_v1 = vld [vmem:[#allocation5] sm:$0xff]   ;;  %v389_v2 = vld [vmem:[#allocation5 + $0x8] sm:$0xff]  }
  0x37   :  { %340 = vmatprep.subr.bf16.mxu0 %v507_v0  ;;  %356 = vmatprep.mubr.msk.bf16.mxu0 %vm508_vm0, %v507_v0  ;;  %v390_v3 = vld [vmem:[#allocation5 + $0x10] sm:$0xff]   ;;  %v396_v4 = vld [vmem:[#allocation7] sm:$0xff]   ;;  %v391_v5 = vld [vmem:[#allocation5 + $0x18] sm:$0xff]  }
  0x38   :  { %360 = vmatprep.subr.bf16.mxu1 %v507_v0  ;;  %376 = vmatprep.mubr.msk.bf16.mxu1 %vm508_vm0, %v507_v0  ;;  %v397_v6 = vld [vmem:[#allocation7 + $0x8] sm:$0xff]   ;;  %v392_v7 = vld [vmem:[#allocation5 + $0x20] sm:$0xff]   ;;  %v398_v8 = vld [vmem:[#allocation7 + $0x10] sm:$0xff]  }
  0x39   :  { %341 = vmatpush3.bf16.msra.mxu0 %v388_v1  ;;  %361 = vmatpush3.bf16.msra.mxu1 %v396_v4  ;;  %v393_v9 = vld [vmem:[#allocation5 + $0x28] sm:$0xff]   ;;  %v399_v10 = vld [vmem:[#allocation7 + $0x18] sm:$0xff]   ;;  %v394_v11 = vld [vmem:[#allocation5 + $0x30] sm:$0xff]  }
  0x3a   :  { %342 = vmatprep.subr.bf16.mxu0 %v507_v0  ;;  %362 = vmatprep.subr.bf16.mxu1 %v507_v0  ;;  %v395_v12 = vld [vmem:[#allocation5 + $0x38] sm:$0xff]   ;;  %v400_v14 = vld [vmem:[#allocation7 + $0x20] sm:$0xff]   ;;  %v401_v15 = vld [vmem:[#allocation7 + $0x28] sm:$0xff]  }
  0x3b   :  { %v61_v13 = vld [vmem:[#allocation2] sm:$0xf]  ;;  %v402_v16 = vld [vmem:[#allocation7 + $0x30] sm:$0xff]  }
  0x3c   :  { %v403_v17 = vld [vmem:[#allocation7 + $0x38] sm:$0xff]  }
  0x3d   :  { %343 = vmatpush3.bf16.msra.mxu0 %v389_v2  ;;  %363 = vmatpush3.bf16.msra.mxu1 %v397_v6  ;;  %v304_v18 = vld [vmem:[%s602_s2] ss:$0 sm:$0xff]  ;;  %s509_s2 = smov [#allocation8]  }
  0x3e   :  { %344 = vmatprep.subr.bf16.mxu0 %v507_v0  ;;  %364 = vmatprep.subr.bf16.mxu1 %v507_v0  ;;  %v313_v26 = vld [vmem:[%s604_s4] ss:$0 sm:$0xff]  ;;  %s294_s7 = sshll.u32 %s509_s2, 4  ;;  %s295_s7 = int_to_ptr.vmem [resolvable:$true] %s294_s7 }
  0x3f   :  { %s474_s8 = scalar_lea.vmem %s295_s7, 128  ;;  %p479_p11 = scmp.lt.s32.totalorder %s295_s7, %s295_s7 }
  0x40   :  { %p475_p10 = scmp.ne.s32.totalorder %s295_s7, %s474_s8  ;;  %p480_p12 = scmp.lt.s32.totalorder %s474_s8, %s474_s8 }
  0x41   :  { %345 = vmatpush3.bf16.msra.mxu0 %v390_v3  ;;  %365 = vmatpush3.bf16.msra.mxu1 %v398_v8 }
  0x42   :  { %346 = vmatprep.subr.bf16.mxu0 %v507_v0  ;;  %366 = vmatprep.subr.bf16.mxu1 %v507_v0  ;;  %p481_p13 = por %p480_p12, %p479_p11 }
  0x44   :  { %p482_p0 = pnand %p481_p13, %p475_p10 }
  0x45   :  { %347 = vmatpush3.bf16.msra.mxu0 %v391_v5  ;;  %367 = vmatpush3.bf16.msra.mxu1 %v399_v10 }
  0x46   :  { %348 = vmatprep.subr.bf16.mxu0 %v507_v0  ;;  %368 = vmatprep.subr.bf16.mxu1 %v507_v0 }
  0x49   :  { %349 = vmatpush3.bf16.msra.mxu0 %v392_v7  ;;  %369 = vmatpush3.bf16.msra.mxu1 %v400_v14 }
  0x4a   :  { %350 = vmatprep.subr.bf16.mxu0 %v507_v0  ;;  %370 = vmatprep.subr.bf16.mxu1 %v507_v0 }
  0x4d   :  { %351 = vmatpush3.bf16.msra.mxu0 %v393_v9  ;;  %371 = vmatpush3.bf16.msra.mxu1 %v401_v15 }
  0x4e   :  { %352 = vmatprep.subr.bf16.mxu0 %v507_v0  ;;  %372 = vmatprep.subr.bf16.mxu1 %v507_v0 }
  0x51   :  { %353 = vmatpush3.bf16.msra.mxu0 %v394_v11  ;;  %373 = vmatpush3.bf16.msra.mxu1 %v402_v16 }
  0x52   :  { %354 = vmatprep.subr.bf16.mxu0 %v507_v0  ;;  %374 = vmatprep.subr.bf16.mxu1 %v507_v0 }
  0x55   :  { %355 = vmatpush3.bf16.msra.mxu0 %v395_v12  ;;  %375 = vmatpush3.bf16.msra.mxu1 %v403_v17 }
  0x58   :  { %357 = vmatmul.mubr.bf16.vlgmr.msra.gmra.mrb[0].mxu0 %v61_v13 }
 0x12b   :  { %v167_v19 = vpop.f32.mrb[0].mxu0 }
 0x12c   :  { %v168_v20 = vadd.f32 %v304_v18, %v167_v19  ;;  %v358_v21 = vpop.f32.mrb[1].mxu0 }
 0x12d   :  { %v170_v22 = vpop.f32.mrb[2].mxu0 }
 0x12e   :  { %404 = vtanh.f32 %v168_v20  ;;  %v359_v23 = vpop.f32.mrb[3].mxu0 }
 0x138   :  { %v405_v24 = vpop.eup %404 }
 0x139   :  { %v174_v25 = vpack.c.bf16 %v405_v24, %v405_v24 }
 0x13b   :  { %377 = vmatmul.mubr.bf16.vlgmr.msra.gmra.mrb[0].mxu1 %v174_v25 }
 0x20e   :  { %v280_v27 = vpop.f32.mrb[0].mxu1 }
 0x20f   :  { %v281_v28 = vadd.f32 %v313_v26, %v280_v27  ;;  %v378_v29 = vpop.f32.mrb[1].mxu1 }
 0x210   :  { %v283_v30 = vpop.f32.mrb[2].mxu1 }
 0x211   :  { %406 = vtanh.f32 %v281_v28  ;;  %v379_v31 = vpop.f32.mrb[3].mxu1 }
 0x21b   :  { %v407_v32 = vpop.eup %406 }
 0x21c   :  { %287 = vst [vmem:[#allocation8] sm:$0xff] %v407_v32 }
 0x21d   :  { %485 = shalt.err (!%p482_p0)
}
 0x21e   :  { %s486_s10 = scalar_lea.hbm %s605_s5, 128 }
 0x21f   :  { %p487_p1 = scmp.ne.s32.totalorder %s605_s5, %s486_s10  ;;  %p490_p2 = scmp.lt.u32.totalorder %s486_s10, %s605_s5 }
 0x221   :  { %p492_p3 = pnand %p490_p2, %p487_p1 }
 0x223   :  { %495 = shalt.err (!%p492_p3)
}
 0x224   :  { %297 = dma.vmem_to_hbm [thread:$0]  %s295_s7, 128, %s605_s5, [#allocation4]  }
 0x225   :  { %500 = dma.done.wait [#allocation4], 128  }
 0x226   :  { %501 = vsyncadd [#allocation4], 4294967168 }
 0x227   :  { %301 = vsyncpa [#allocation3], 1 }
 0x228   :  { %302 = vsyncpa [#allocation6], 1 }
 0x229   :  { %303 = vsyncpa [#allocation4], 1 }

// kernel: tpu_custom_call.1
= control target key start
LH: loop header
LB: loop body
LE: loop exit
PB: predicated region body
PF: predicated region fallthrough
CT: control target
= control target key end

     0   :  { %10 = vsyncpa [#allocation3], 0  ;;  %s600_s0 = inlined_call_operand.hbm [shape: bf16[8,128], index: 0, kind: input, shape index: {}]   ;;  %s601_s1 = inlined_call_operand.hbm [shape: bf16[128,128], index: 1, kind: input, shape index: {}]   ;;  %s602_s2 = inlined_call_operand.vmem [shape: f32[1,128], index: 2, kind: input, shape index: {}]   ;;  %s603_s3 = inlined_call_operand.hbm [shape: bf16[128,128], index: 3, kind: input, shape index: {}]   ;;  %s604_s4 = inlined_call_operand.vmem [shape: f32[1,128], index: 4, kind: input, shape index: {}]   ;;  %s605_s5 = inlined_call_operand.hbm [shape: f32[8,128], index: 5, kind: output, shape index: {}]  }
   0x1   :  { %11 = vsyncpa [#allocation6], 0 }
   0x2   :  { %12 = vsyncpa [#allocation4], 0  ;;  %s502_s18 = smov [#allocation5]   ;;  %s408_s22 = scalar_lea.hbm %s601_s1, 1024 }
   0x3   :  { %s28_s19 = sshll.u32 %s502_s18, 4  ;;  %p409_p0 = scmp.ne.s32.totalorder %s601_s1, %s408_s22  ;;  %s29_s19 = int_to_ptr.vmem [resolvable:$true] %s28_s19 }
   0x4   :  { %p412_p1 = scmp.lt.u32.totalorder %s408_s22, %s601_s1 }
   0x6   :  { %p414_p2 = pnand %p412_p1, %p409_p0 }
   0x8   :  { %417 = shalt.err (!%p414_p2)
}
   0x9   :  { %s418_s27 = scalar_lea.vmem %s29_s19, 1024  ;;  %p423_p4 = scmp.lt.s32.totalorder %s29_s19, %s29_s19 }
   0xa   :  { %p419_p3 = scmp.ne.s32.totalorder %s29_s19, %s418_s27  ;;  %p424_p5 = scmp.lt.s32.totalorder %s418_s27, %s418_s27 }
   0xc   :  { %p425_p6 = por %p424_p5, %p423_p4 }
   0xe   :  { %p426_p7 = pnand %p425_p6, %p419_p3 }
  0x10   :  { %429 = shalt.err (!%p426_p7)
}
  0x11   :  { %s503_s28 = smov 64   ;;  %s504_s29 = smov 4  }
  0x12   :  { %34 = dma.hbm_to_vmem [thread:$0]  %s601_s1, 1024, %s29_s19, [#allocation6], %s503_s28, %s503_s28, %s504_s29  }
  0x13   :  { %s505_s7 = smov [#allocation2]   ;;  %s506_s9 = smov [#allocation7]  }
  0x14   :  { %s19_s8 = sshll.u32 %s505_s7, 4  ;;  %s42_s10 = sshll.u32 %s506_s9, 4  ;;  %s20_s8 = int_to_ptr.vmem [resolvable:$true] %s19_s8  ;;  %s43_s10 = int_to_ptr.vmem [resolvable:$true] %s42_s10 }
  0x15   :  { %s430_s13 = scalar_lea.hbm %s600_s0, 64 }
  0x16   :  { %p431_p8 = scmp.ne.s32.totalorder %s600_s0, %s430_s13  ;;  %p434_p9 = scmp.lt.u32.totalorder %s430_s13, %s600_s0 }
  0x18   :  { %p436_p10 = pnand %p434_p9, %p431_p8 }
  0x1a   :  { %439 = shalt.err (!%p436_p10)
}
  0x1b   :  { %s440_s1 = scalar_lea.vmem %s20_s8, 64  ;;  %p445_p12 = scmp.lt.s32.totalorder %s20_s8, %s20_s8 }
  0x1c   :  { %p441_p11 = scmp.ne.s32.totalorder %s20_s8, %s440_s1  ;;  %p446_p13 = scmp.lt.s32.totalorder %s440_s1, %s440_s1 }
  0x1e   :  { %p447_p0 = por %p446_p13, %p445_p12 }
  0x20   :  { %p448_p1 = pnand %p447_p0, %p441_p11 }
  0x22   :  { %451 = shalt.err (!%p448_p1)
}
  0x23   :  { %22 = dma.hbm_to_vmem [thread:$0]  %s600_s0, 64, %s20_s8, [#allocation3]  }
  0x24   :  { %s452_s22 = scalar_lea.hbm %s603_s3, 1024 }
  0x25   :  { %p453_p2 = scmp.ne.s32.totalorder %s603_s3, %s452_s22  ;;  %p456_p3 = scmp.lt.u32.totalorder %s452_s22, %s603_s3 }
  0x27   :  { %p458_p4 = pnand %p456_p3, %p453_p2 }
  0x29   :  { %461 = shalt.err (!%p458_p4)
}
  0x2a   :  { %s462_s27 = scalar_lea.vmem %s43_s10, 1024  ;;  %p467_p6 = scmp.lt.s32.totalorder %s43_s10, %s43_s10 }
  0x2b   :  { %p463_p5 = scmp.ne.s32.totalorder %s43_s10, %s462_s27  ;;  %p468_p7 = scmp.lt.s32.totalorder %s462_s27, %s462_s27 }
  0x2d   :  { %p469_p8 = por %p468_p7, %p467_p6 }
  0x2f   :  { %p470_p9 = pnand %p469_p8, %p463_p5 }
  0x31   :  { %473 = shalt.err (!%p470_p9)
}
  0x32   :  { %48 = dma.hbm_to_vmem [thread:$0]  %s603_s3, 1024, %s43_s10, [#allocation6], %s503_s28, %s503_s28, %s504_s29  }
  0x33   :  { %496 = dma.done.wait [#allocation3], 64  }
  0x34   :  { %497 = vsyncadd [#allocation3], 4294967232 }
  0x35   :  { %498 = dma.done.wait [#allocation6], 2048  }
  0x36   :  { %499 = vsyncadd [#allocation6], 4294965248  ;;  %v507_v0 = vmov 0.0   ;;  %vm508_vm0 = vmmov 0   ;;  %v388_v1 = vld [vmem:[#allocation5] sm:$0xff]   ;;  %v389_v2 = vld [vmem:[#allocation5 + $0x8] sm:$0xff]  }
  0x37   :  { %340 = vmatprep.subr.bf16.mxu0 %v507_v0  ;;  %356 = vmatprep.mubr.msk.bf16.mxu0 %vm508_vm0, %v507_v0  ;;  %v390_v3 = vld [vmem:[#allocation5 + $0x10] sm:$0xff]   ;;  %v396_v4 = vld [vmem:[#allocation7] sm:$0xff]   ;;  %v391_v5 = vld [vmem:[#allocation5 + $0x18] sm:$0xff]  }
  0x38   :  { %360 = vmatprep.subr.bf16.mxu1 %v507_v0  ;;  %376 = vmatprep.mubr.msk.bf16.mxu1 %vm508_vm0, %v507_v0  ;;  %v397_v6 = vld [vmem:[#allocation7 + $0x8] sm:$0xff]   ;;  %v392_v7 = vld [vmem:[#allocation5 + $0x20] sm:$0xff]   ;;  %v398_v8 = vld [vmem:[#allocation7 + $0x10] sm:$0xff]  }
  0x39   :  { %341 = vmatpush3.bf16.msra.mxu0 %v388_v1  ;;  %361 = vmatpush3.bf16.msra.mxu1 %v396_v4  ;;  %v393_v9 = vld [vmem:[#allocation5 + $0x28] sm:$0xff]   ;;  %v399_v10 = vld [vmem:[#allocation7 + $0x18] sm:$0xff]   ;;  %v394_v11 = vld [vmem:[#allocation5 + $0x30] sm:$0xff]  }
  0x3a   :  { %342 = vmatprep.subr.bf16.mxu0 %v507_v0  ;;  %362 = vmatprep.subr.bf16.mxu1 %v507_v0  ;;  %v395_v12 = vld [vmem:[#allocation5 + $0x38] sm:$0xff]   ;;  %v400_v14 = vld [vmem:[#allocation7 + $0x20] sm:$0xff]   ;;  %v401_v15 = vld [vmem:[#allocation7 + $0x28] sm:$0xff]  }
  0x3b   :  { %v61_v13 = vld [vmem:[#allocation2] sm:$0xf]  ;;  %v402_v16 = vld [vmem:[#allocation7 + $0x30] sm:$0xff]  }
  0x3c   :  { %v403_v17 = vld [vmem:[#allocation7 + $0x38] sm:$0xff]  }
  0x3d   :  { %343 = vmatpush3.bf16.msra.mxu0 %v389_v2  ;;  %363 = vmatpush3.bf16.msra.mxu1 %v397_v6  ;;  %v304_v18 = vld [vmem:[%s602_s2] ss:$0 sm:$0xff]  ;;  %s509_s2 = smov [#allocation8]  }
  0x3e   :  { %344 = vmatprep.subr.bf16.mxu0 %v507_v0  ;;  %364 = vmatprep.subr.bf16.mxu1 %v507_v0  ;;  %v313_v26 = vld [vmem:[%s604_s4] ss:$0 sm:$0xff]  ;;  %s294_s7 = sshll.u32 %s509_s2, 4  ;;  %s295_s7 = int_to_ptr.vmem [resolvable:$true] %s294_s7 }
  0x3f   :  { %s474_s8 = scalar_lea.vmem %s295_s7, 128  ;;  %p479_p11 = scmp.lt.s32.totalorder %s295_s7, %s295_s7 }
  0x40   :  { %p475_p10 = scmp.ne.s32.totalorder %s295_s7, %s474_s8  ;;  %p480_p12 = scmp.lt.s32.totalorder %s474_s8, %s474_s8 }
  0x41   :  { %345 = vmatpush3.bf16.msra.mxu0 %v390_v3  ;;  %365 = vmatpush3.bf16.msra.mxu1 %v398_v8 }
  0x42   :  { %346 = vmatprep.subr.bf16.mxu0 %v507_v0  ;;  %366 = vmatprep.subr.bf16.mxu1 %v507_v0  ;;  %p481_p13 = por %p480_p12, %p479_p11 }
  0x44   :  { %p482_p0 = pnand %p481_p13, %p475_p10 }
  0x45   :  { %347 = vmatpush3.bf16.msra.mxu0 %v391_v5  ;;  %367 = vmatpush3.bf16.msra.mxu1 %v399_v10 }
  0x46   :  { %348 = vmatprep.subr.bf16.mxu0 %v507_v0  ;;  %368 = vmatprep.subr.bf16.mxu1 %v507_v0 }
  0x49   :  { %349 = vmatpush3.bf16.msra.mxu0 %v392_v7  ;;  %369 = vmatpush3.bf16.msra.mxu1 %v400_v14 }
  0x4a   :  { %350 = vmatprep.subr.bf16.mxu0 %v507_v0  ;;  %370 = vmatprep.subr.bf16.mxu1 %v507_v0 }
  0x4d   :  { %351 = vmatpush3.bf16.msra.mxu0 %v393_v9  ;;  %371 = vmatpush3.bf16.msra.mxu1 %v401_v15 }
  0x4e   :  { %352 = vmatprep.subr.bf16.mxu0 %v507_v0  ;;  %372 = vmatprep.subr.bf16.mxu1 %v507_v0 }
  0x51   :  { %353 = vmatpush3.bf16.msra.mxu0 %v394_v11  ;;  %373 = vmatpush3.bf16.msra.mxu1 %v402_v16 }
  0x52   :  { %354 = vmatprep.subr.bf16.mxu0 %v507_v0  ;;  %374 = vmatprep.subr.bf16.mxu1 %v507_v0 }
  0x55   :  { %355 = vmatpush3.bf16.msra.mxu0 %v395_v12  ;;  %375 = vmatpush3.bf16.msra.mxu1 %v403_v17 }
  0x58   :  { %357 = vmatmul.mubr.bf16.vlgmr.msra.gmra.mrb[0].mxu0 %v61_v13 }
 0x12b   :  { %v167_v19 = vpop.f32.mrb[0].mxu0 }
 0x12c   :  { %v168_v20 = vadd.f32 %v304_v18, %v167_v19  ;;  %v358_v21 = vpop.f32.mrb[1].mxu0 }
 0x12d   :  { %v170_v22 = vpop.f32.mrb[2].mxu0 }
 0x12e   :  { %404 = vtanh.f32 %v168_v20  ;;  %v359_v23 = vpop.f32.mrb[3].mxu0 }
 0x138   :  { %v405_v24 = vpop.eup %404 }
 0x139   :  { %v174_v25 = vpack.c.bf16 %v405_v24, %v405_v24 }
 0x13b   :  { %377 = vmatmul.mubr.bf16.vlgmr.msra.gmra.mrb[0].mxu1 %v174_v25 }
 0x20e   :  { %v280_v27 = vpop.f32.mrb[0].mxu1 }
 0x20f   :  { %v281_v28 = vadd.f32 %v313_v26, %v280_v27  ;;  %v378_v29 = vpop.f32.mrb[1].mxu1 }
 0x210   :  { %v283_v30 = vpop.f32.mrb[2].mxu1 }
 0x211   :  { %406 = vtanh.f32 %v281_v28  ;;  %v379_v31 = vpop.f32.mrb[3].mxu1 }
 0x21b   :  { %v407_v32 = vpop.eup %406 }
 0x21c   :  { %287 = vst [vmem:[#allocation8] sm:$0xff] %v407_v32 }
 0x21d   :  { %485 = shalt.err (!%p482_p0)
}
 0x21e   :  { %s486_s10 = scalar_lea.hbm %s605_s5, 128 }
 0x21f   :  { %p487_p1 = scmp.ne.s32.totalorder %s605_s5, %s486_s10  ;;  %p490_p2 = scmp.lt.u32.totalorder %s486_s10, %s605_s5 }
 0x221   :  { %p492_p3 = pnand %p490_p2, %p487_p1 }
 0x223   :  { %495 = shalt.err (!%p492_p3)
}
 0x224   :  { %297 = dma.vmem_to_hbm [thread:$0]  %s295_s7, 128, %s605_s5, [#allocation4]  }
 0x225   :  { %500 = dma.done.wait [#allocation4], 128  }
 0x226   :  { %501 = vsyncadd [#allocation4], 4294967168 }
 0x227   :  { %301 = vsyncpa [#allocation3], 1 }
 0x228   :  { %302 = vsyncpa [#allocation6], 1 }
 0x229   :  { %303 = vsyncpa [#allocation4], 1 }

</bundles_post_ra>
